<compile_context>
chip_gen: v7x
topology: tpu7x:2x2x1
jax: 0.10.0
libtpu: 0.0.40
codegen_flags: <defaults>
</compile_context>

<pallas_src>
import functools
import math

import jax
import jax.numpy as jnp
from jax import lax
from jax.experimental import pallas as pl
from jax.experimental.pallas import tpu as pltpu


def _freq_layer_kernel(x_ref, f_ref, g_ref, gt_ref, p_ref, o_ref, *, eps):
    """One lane tile of the fused (batch*hidden) axis.

    x_ref : (S, TN)      input slab, seq-major, lanes = fused (b, h)
    f_ref : (S, S)       low-pass filter matrix (grid-constant, resident)
    g_ref : (TN, SEGP)   segment-mean matrix (entries 1/H; zero padded cols)
    gt_ref: (SEGP, TN)   segment-broadcast indicator (zero padded rows)
    p_ref : (4, TN)      packed params [1+beta^2, 1-beta^2, gamma, bias]
    o_ref : (S, TN)      output slab (input dtype)
    """
    x = x_ref[...].astype(jnp.float32)                               # (S, TN)
    F = f_ref[...]                                                   # (S, S) f32
    p = p_ref[...]                                                   # (4, TN) f32
    s_len = x.shape[0]

    # Low-pass filter along seq (== rfft -> zero freqs >= c -> irfft, ortho).
    low = jnp.dot(F, x, preferred_element_type=jnp.float32)          # (S, TN)

    # y = low + beta^2*(x - low) + x  ==  (1+beta^2)*x + (1-beta^2)*low
    y = p[0:1, :] * x + p[1:2, :] * low                              # (S, TN)

    # LayerNorm over each H-lane segment.  One stacked skinny matmul (K = TN)
    # gives segment sums of y and y*y in independent MXU pushes.
    stacked = jnp.concatenate([y, y * y], axis=0)                    # (2S, TN)
    sums = jnp.dot(stacked, g_ref[...],
                   preferred_element_type=jnp.float32)               # (2S, SEGP)
    mean = sums[:s_len, :]                                           # E[y]
    ex2 = sums[s_len:, :]                                            # E[y^2]
    # Uncentered variance; clamp guards tiny negative rounding residue.
    var = jnp.maximum(ex2 - mean * mean, 0.0)
    # eps > 0 keeps zero-padded segments finite (they are sliced off outside).
    rstd = lax.rsqrt(var + eps)
    # Broadcast per-segment stats back to lanes with one skinny matmul.
    stats = jnp.concatenate([mean, rstd], axis=0)                    # (2S, SEGP)
    bcast = jnp.dot(stats, gt_ref[...],
                    preferred_element_type=jnp.float32)              # (2S, TN)
    yn = (y - bcast[:s_len, :]) * bcast[s_len:, :]
    o_ref[...] = (p[2:3, :] * yn + p[3:4, :]).astype(o_ref.dtype)


def make_lowpass_matrix(seq_len: int, c: int) -> jnp.ndarray:
    """Real (S, S) matrix F with F @ v == irfft(mask_{<c} * rfft(v, ortho), ortho)."""
    eye = jnp.eye(seq_len, dtype=jnp.float32)
    xf = jnp.fft.rfft(eye, axis=0, norm="ortho")                     # (S//2+1, S)
    mask = (jnp.arange(xf.shape[0]) < c)[:, None].astype(xf.dtype)
    low = jnp.fft.irfft(xf * mask, n=seq_len, axis=0, norm="ortho")  # (S, S)
    # TODO(synk): for seq_len in the thousands, use the rank-(2c-1) factor
    # F = Bc @ Bc.T (two skinny matmuls; fits v7x's 64 MiB VMEM) and feed the
    # MXU bf16 operands with f32 accumulation on v6e/v7x (re-validate 1e-4).
    return low.astype(jnp.float32)


def _round_up(x: int, m: int) -> int:
    return -(-x // m) * m


def _pick_lane_tile(n_fused: int, hidden: int, target: int = 1024) -> int:
    """Lane tile for the fused (B*H) axis: a multiple of both H (LayerNorm
    segments never straddle a tile) and 128 (lane-dense, unmasked stores).
    Prefers >= 2 tiles when possible so the 'parallel' axis splits across
    v7x's two TensorCores."""
    step = (hidden * 128) // math.gcd(hidden, 128)                   # lcm(H,128)
    n_min = _round_up(max(n_fused, 1), step)                         # lane-dense width
    if n_min <= step:
        return n_min                         # single minimal-granularity tile
    cap = max(step, (target // step) * step)
    half = max(step, _round_up(n_min // 2, step))
    return min(cap, half)


def frequency_layer(input_tensor, sqrt_beta, ln_weight, ln_bias, *,
                    c, eps=1e-12, lane_tile_target=1024):
    """input_tensor: (B, S, H).  sqrt_beta: (1, 1, H).  ln_*: (H,)."""
    B, S, H = input_tensor.shape
    N = B * H
    dtype = input_tensor.dtype

    # Seq-major, fused (batch, hidden) lane layout; NO host dtype up-cast.
    # TODO(synk): have the surrounding model produce/consume this (S, B*H)
    # layout directly (or do the per-tile relayout in-kernel with
    # pltpu.einshape) to drop these two full HBM transpose passes.
    x2d = jnp.transpose(input_tensor, (1, 0, 2)).reshape(S, N)

    TN = _pick_lane_tile(N, H, lane_tile_target)
    grid_n = pl.cdiv(N, TN)
    n_pad = grid_n * TN
    if n_pad != N:
        x2d = jnp.pad(x2d, ((0, 0), (0, n_pad - N)))

    # Exact low-pass operator along seq (rfft -> zero -> irfft, ortho norm).
    F = make_lowpass_matrix(S, c)                                    # (S, S)

    # Factored segment-sum operators (replace the old dense block-diag Mavg).
    segs = TN // H
    segs_p = _round_up(segs, 8)                  # pad skinny matmul dim to >= 8
    seg_of_lane = jnp.arange(TN) // H                                # (TN,)
    Gt = (jnp.arange(segs_p)[:, None] == seg_of_lane[None, :]
          ).astype(jnp.float32)                                      # (SEGP, TN)
    G = Gt.T * (1.0 / H)                                             # (TN, SEGP)

    # Packed params: rows = [1+beta^2, 1-beta^2, gamma, bias], tiled per batch.
    # Padded lanes are zeroed (gamma=bias=0), so they emit 0 and are sliced off.
    beta2 = sqrt_beta.reshape(H).astype(jnp.float32) ** 2
    P = jnp.stack([1.0 + beta2,
                   1.0 - beta2,
                   ln_weight.reshape(H).astype(jnp.float32),
                   ln_bias.reshape(H).astype(jnp.float32)], axis=0)  # (4, H)
    P = jnp.tile(P, (1, B))                                          # (4, B*H)
    if n_pad != N:
        P = jnp.pad(P, ((0, 0), (0, n_pad - N)))

    # VMEM budget: residents + double-buffered x/out slabs + params.
    itemsize = jnp.dtype(dtype).itemsize
    resident = S * S * 4 + 2 * TN * segs_p * 4
    per_step = 2 * (S * TN * itemsize) + 4 * TN * 4
    est = resident + 2 * per_step
    compiler_kwargs = dict(dimension_semantics=("parallel",))
    if 2 * est > (16 << 20):        # only override beyond v5e's default limit
        compiler_kwargs["vmem_limit_bytes"] = int(min(2 * est, 64 << 20))
    # TODO(synk): on v7x, single-buffer the grid-constant F/G/Gt operands
    # (pipeline_mode=pl.Buffered(1)) to free VMEM for even larger lane tiles.

    kernel = functools.partial(_freq_layer_kernel, eps=eps)
    out2d = pl.pallas_call(
        kernel,
        out_shape=jax.ShapeDtypeStruct((S, n_pad), dtype),
        grid_spec=pltpu.PrefetchScalarGridSpec(
            num_scalar_prefetch=0,
            grid=(grid_n,),
            in_specs=[
                pl.BlockSpec((S, TN), lambda n: (0, n)),        # x slab
                pl.BlockSpec((S, S), lambda n: (0, 0)),         # F   (resident)
                pl.BlockSpec((TN, segs_p), lambda n: (0, 0)),   # G   (resident)
                pl.BlockSpec((segs_p, TN), lambda n: (0, 0)),   # G^T (resident)
                pl.BlockSpec((4, TN), lambda n: (0, n)),        # packed params
            ],
            out_specs=pl.BlockSpec((S, TN), lambda n: (0, n)),
        ),
        compiler_params=pltpu.CompilerParams(**compiler_kwargs),
    )(x2d, F, G, Gt, P)

    out = out2d[:, :N].reshape(S, B, H)
    return jnp.transpose(out, (1, 0, 2))


def frequency_layer_ref(input_tensor, sqrt_beta, ln_weight, ln_bias, *, c, eps=1e-12):
    """Pure-JAX reference mirroring the PyTorch forward (dropout = identity)."""
    B, S, H = input_tensor.shape
    xf = jnp.fft.rfft(input_tensor, axis=1, norm="ortho")
    mask = (jnp.arange(xf.shape[1]) < c)[None, :, None].astype(xf.dtype)
    low = jnp.fft.irfft(xf * mask, n=S, axis=1, norm="ortho").astype(jnp.float32)
    high = input_tensor - low
    emb = low + (sqrt_beta ** 2) * high
    y = emb + input_tensor
    u = jnp.mean(y, axis=-1, keepdims=True)
    s = jnp.mean((y - u) ** 2, axis=-1, keepdims=True)
    yn = (y - u) / jnp.sqrt(s + eps)
    return ln_weight * yn + ln_bias


if __name__ == "__main__":
    # Small shapes consistent with the module: (batch, seq_len, hidden).
    B, S, H = 2, 8, 32
    args_c = 5                       # args.c
    c = args_c // 2 + 1              # self.c = args.c // 2 + 1

    key = jax.random.PRNGKey(0)
    k_x, k_beta = jax.random.split(key)
    x = jax.random.normal(k_x, (B, S, H), dtype=jnp.float32)
    sqrt_beta = jax.random.normal(k_beta, (1, 1, H), dtype=jnp.float32)  # nn.Parameter(randn)
    ln_weight = jnp.ones((H,), dtype=jnp.float32)
    ln_bias = jnp.zeros((H,), dtype=jnp.float32)

    out = frequency_layer(x, sqrt_beta, ln_weight, ln_bias, c=c)
    out = jax.block_until_ready(out)

    ref = frequency_layer_ref(x, sqrt_beta, ln_weight, ln_bias, c=c)
    assert out.shape == (B, S, H)
    assert jnp.allclose(out, ref, atol=1e-4, rtol=1e-4), "mismatch vs reference"

    print("KERNEL_OK")
</pallas_src>

<mosaic_0001>
module attributes {stable_mosaic.version = 11 : i64} {
  func.func @_freq_layer_kernel(%arg0: i32, %arg1: memref<8x128xf32, #tpu.memory_space<vmem>>, %arg2: memref<8x8xf32, #tpu.memory_space<vmem>>, %arg3: memref<128x8xf32, #tpu.memory_space<vmem>>, %arg4: memref<8x128xf32, #tpu.memory_space<vmem>>, %arg5: memref<4x128xf32, #tpu.memory_space<vmem>>, %arg6: memref<8x128xf32, #tpu.memory_space<vmem>>) attributes {dimension_semantics = [#tpu.dimension_semantics<parallel>], iteration_bounds = array<i64: 1>, scalar_prefetch = 0 : i64, scratch_operands = 0 : i64, tpu.core_type = #tpu.core_type<tc>, window_params = [{transform_indices = @transform_0, window_bounds = array<i64: 8, 128>}, {pipeline_mode = #tpu.pipeline_mode<synchronous>, transform_indices = @transform_1, window_bounds = array<i64: 8, 8>}, {pipeline_mode = #tpu.pipeline_mode<synchronous>, transform_indices = @transform_2, window_bounds = array<i64: 128, 8>}, {pipeline_mode = #tpu.pipeline_mode<synchronous>, transform_indices = @transform_3, window_bounds = array<i64: 8, 128>}, {transform_indices = @transform_4, window_bounds = array<i64: 4, 128>}, {transform_indices = @transform_5, window_bounds = array<i64: 8, 128>}]} {
    %c0 = arith.constant 0 : index
    %c0_0 = arith.constant 0 : index
    %0 = vector.load %arg1[%c0, %c0_0] : memref<8x128xf32, #tpu.memory_space<vmem>>, vector<8x128xf32>
    %c0_1 = arith.constant 0 : index
    %c0_2 = arith.constant 0 : index
    %1 = vector.load %arg2[%c0_1, %c0_2] : memref<8x8xf32, #tpu.memory_space<vmem>>, vector<8x8xf32>
    %c0_3 = arith.constant 0 : index
    %c0_4 = arith.constant 0 : index
    %2 = vector.load %arg5[%c0_3, %c0_4] : memref<4x128xf32, #tpu.memory_space<vmem>>, vector<4x128xf32>
    %cst = arith.constant dense<0.000000e+00> : vector<8x128xf32>
    %3 = tpu.matmul %1, %0, %cst {dimension_numbers = #tpu.dot_dimension_numbers<[1], [0], [0], [1], [0, 0, 1, 1], [], []>} : vector<8x8xf32>, vector<8x128xf32>, vector<8x128xf32> -> vector<8x128xf32>
    %4 = vector.extract_strided_slice %2 {offsets = [0, 0], sizes = [1, 128], strides = [1, 1]} : vector<4x128xf32> to vector<1x128xf32>
    %5 = vector.broadcast %4 : vector<1x128xf32> to vector<8x128xf32>
    %6 = arith.mulf %5, %0 : vector<8x128xf32>
    %7 = vector.extract_strided_slice %2 {offsets = [1, 0], sizes = [1, 128], strides = [1, 1]} : vector<4x128xf32> to vector<1x128xf32>
    %8 = vector.broadcast %7 : vector<1x128xf32> to vector<8x128xf32>
    %9 = arith.mulf %8, %3 : vector<8x128xf32>
    %10 = arith.addf %6, %9 : vector<8x128xf32>
    %11 = arith.mulf %10, %10 : vector<8x128xf32>
    %12 = tpu.concatenate %10, %11 in 0 : vector<8x128xf32>, vector<8x128xf32> -> vector<16x128xf32>
    %c0_5 = arith.constant 0 : index
    %c0_6 = arith.constant 0 : index
    %13 = vector.load %arg3[%c0_5, %c0_6] : memref<128x8xf32, #tpu.memory_space<vmem>>, vector<128x8xf32>
    %cst_7 = arith.constant dense<0.000000e+00> : vector<16x8xf32>
    %14 = tpu.matmul %12, %13, %cst_7 {dimension_numbers = #tpu.dot_dimension_numbers<[1], [0], [0], [1], [0, 0, 1, 1], [], []>} : vector<16x128xf32>, vector<128x8xf32>, vector<16x8xf32> -> vector<16x8xf32>
    %15 = vector.extract_strided_slice %14 {offsets = [0, 0], sizes = [8, 8], strides = [1, 1]} : vector<16x8xf32> to vector<8x8xf32>
    %16 = vector.extract_strided_slice %14 {offsets = [8, 0], sizes = [8, 8], strides = [1, 1]} : vector<16x8xf32> to vector<8x8xf32>
    %17 = arith.mulf %15, %15 : vector<8x8xf32>
    %18 = arith.subf %16, %17 : vector<8x8xf32>
    %cst_8 = arith.constant 0.000000e+00 : f32
    %19 = vector.broadcast %cst_8 : f32 to vector<8x8xf32>
    %20 = arith.maximumf %18, %19 : vector<8x8xf32>
    %cst_9 = arith.constant 9.99999996E-13 : f32
    %21 = vector.broadcast %cst_9 : f32 to vector<8x8xf32>
    %22 = arith.addf %20, %21 : vector<8x8xf32>
    %23 = math.rsqrt %22 : vector<8x8xf32>
    %24 = tpu.concatenate %15, %23 in 0 : vector<8x8xf32>, vector<8x8xf32> -> vector<16x8xf32>
    %c0_10 = arith.constant 0 : index
    %c0_11 = arith.constant 0 : index
    %25 = vector.load %arg4[%c0_10, %c0_11] : memref<8x128xf32, #tpu.memory_space<vmem>>, vector<8x128xf32>
    %cst_12 = arith.constant dense<0.000000e+00> : vector<16x128xf32>
    %26 = tpu.matmul %24, %25, %cst_12 {dimension_numbers = #tpu.dot_dimension_numbers<[1], [0], [0], [1], [0, 0, 1, 1], [], []>} : vector<16x8xf32>, vector<8x128xf32>, vector<16x128xf32> -> vector<16x128xf32>
    %27 = vector.extract_strided_slice %26 {offsets = [0, 0], sizes = [8, 128], strides = [1, 1]} : vector<16x128xf32> to vector<8x128xf32>
    %28 = arith.subf %10, %27 : vector<8x128xf32>
    %29 = vector.extract_strided_slice %26 {offsets = [8, 0], sizes = [8, 128], strides = [1, 1]} : vector<16x128xf32> to vector<8x128xf32>
    %30 = arith.mulf %28, %29 : vector<8x128xf32>
    %31 = vector.extract_strided_slice %2 {offsets = [2, 0], sizes = [1, 128], strides = [1, 1]} : vector<4x128xf32> to vector<1x128xf32>
    %32 = vector.broadcast %31 : vector<1x128xf32> to vector<8x128xf32>
    %33 = arith.mulf %32, %30 : vector<8x128xf32>
    %34 = vector.extract_strided_slice %2 {offsets = [3, 0], sizes = [1, 128], strides = [1, 1]} : vector<4x128xf32> to vector<1x128xf32>
    %35 = vector.broadcast %34 : vector<1x128xf32> to vector<8x128xf32>
    %36 = arith.addf %33, %35 : vector<8x128xf32>
    %c0_13 = arith.constant 0 : index
    %c0_14 = arith.constant 0 : index
    %37 = vector.load %arg6[%c0_13, %c0_14] : memref<8x128xf32, #tpu.memory_space<vmem>>, vector<8x128xf32>
    tpu.vector_store %arg6[%c0_13, %c0_14], %36 {strides = array<i32>} : memref<8x128xf32, #tpu.memory_space<vmem>>, vector<8x128xf32>,
    return
  }
  func.func @transform_0(%arg0: i32) -> (i32, i32) {
    %c0_i32 = arith.constant 0 : i32
    %c0_i32_0 = arith.constant 0 : i32
    return %c0_i32, %arg0 : i32, i32
  }
  func.func @transform_1(%arg0: i32) -> (i32, i32) {
    %c0_i32 = arith.constant 0 : i32
    %c0_i32_0 = arith.constant 0 : i32
    %c0_i32_1 = arith.constant 0 : i32
    return %c0_i32, %c0_i32_0 : i32, i32
  }
  func.func @transform_2(%arg0: i32) -> (i32, i32) {
    %c0_i32 = arith.constant 0 : i32
    %c0_i32_0 = arith.constant 0 : i32
    %c0_i32_1 = arith.constant 0 : i32
    return %c0_i32, %c0_i32_0 : i32, i32
  }
  func.func @transform_3(%arg0: i32) -> (i32, i32) {
    %c0_i32 = arith.constant 0 : i32
    %c0_i32_0 = arith.constant 0 : i32
    %c0_i32_1 = arith.constant 0 : i32
    return %c0_i32, %c0_i32_0 : i32, i32
  }
  func.func @transform_4(%arg0: i32) -> (i32, i32) {
    %c0_i32 = arith.constant 0 : i32
    %c0_i32_0 = arith.constant 0 : i32
    return %c0_i32, %arg0 : i32, i32
  }
  func.func @transform_5(%arg0: i32) -> (i32, i32) {
    %c0_i32 = arith.constant 0 : i32
    %c0_i32_0 = arith.constant 0 : i32
    return %c0_i32, %arg0 : i32, i32
  }
}

</mosaic_0001>

<bundles_post_ra>
// kernel: tpu_custom_call.1
= control target key start
LH: loop header
LB: loop body
LE: loop exit
PB: predicated region body
PF: predicated region fallthrough
CT: control target
= control target key end

     0   :  { %v447_v2 = vmov 0.0   ;;  %vm448_vm0 = vmmov 0   ;;  %vm24_vm1 = vcmask 64512   ;;  %s555_s0 = inlined_call_operand.vmem [shape: f32[8,128], index: 0, kind: input, shape index: {}]   ;;  %s556_s1 = inlined_call_operand.vmem [shape: f32[8,8], index: 1, kind: input, shape index: {}]   ;;  %s557_s2 = inlined_call_operand.vmem [shape: f32[128,8], index: 2, kind: input, shape index: {}]   ;;  %s558_s3 = inlined_call_operand.vmem [shape: f32[8,128], index: 3, kind: input, shape index: {}]   ;;  %s559_s4 = inlined_call_operand.vmem [shape: f32[4,128], index: 4, kind: input, shape index: {}]   ;;  %s560_s5 = inlined_call_operand.hbm [shape: f32[8,128], index: 5, kind: output, shape index: {}]  }
   0x1   :  { %v21_v0 = vld [vmem:[%s555_s0] sm:$0xff]  ;;  %341 = vmatprep.subr.mxu0 %v447_v2  ;;  %343 = vmatprep.mubr.msk.f32.mxu0 %vm448_vm0, %v447_v2  ;;  %v111_v4 = vld [vmem:[%s557_s2 + $0x8] sm:$0xff]  ;;  %v112_v5 = vld [vmem:[%s557_s2 + $0x10] sm:$0xff] }
   0x2   :  { %v22_v1 = vld [vmem:[%s556_s1] sm:$0xff]  ;;  %342 = vmatpush3.msra.mxu0 %v21_v0  ;;  %v113_v7 = vld [vmem:[%s557_s2 + $0x18] sm:$0xff]  ;;  %v115_v10 = vld [vmem:[%s557_s2 + $0x28] sm:$0xff] }
   0x3   :  { %v110_v3 = vld [vmem:[%s557_s2] sm:$0xff]  ;;  %344 = vmatmul.mubr.msk.f32.vlgmr.msra.gmra.mrb[0].mxu0 %vm24_vm1, %v22_v1  ;;  %v390_v8 = vpack.c.bf16 %v113_v7, %v112_v5 }
   0x4   :  { %v386_v6 = vpack.c.bf16 %v111_v4, %v110_v3  ;;  %v114_v9 = vld [vmem:[%s557_s2 + $0x20] sm:$0xff] }
   0x6   :  { %387 = vmatprep.subr.bf16.mxu1 %v386_v6 }
   0x7   :  { %389 = vmatpush3.bf16.msra.mxu1 %v386_v6 }
   0x8   :  { %10 = vsyncpa [#allocation3], 0  ;;  %391 = vmatprep.subr.bf16.mxu1 %v390_v8  ;;  %v394_v11 = vpack.c.bf16 %v115_v10, %v114_v9  ;;  %v116_v12 = vld [vmem:[%s557_s2 + $0x30] sm:$0xff]  ;;  %v117_v13 = vld [vmem:[%s557_s2 + $0x38] sm:$0xff]  ;;  %v98_v27 = vlaneseq }
   0x9   :  { %v398_v14 = vpack.c.bf16 %v117_v13, %v116_v12  ;;  %v118_v15 = vld [vmem:[%s557_s2 + $0x40] sm:$0xff]  ;;  %v119_v16 = vld [vmem:[%s557_s2 + $0x48] sm:$0xff]  ;;  %v120_v18 = vld [vmem:[%s557_s2 + $0x50] sm:$0xff] }
   0xa   :  { %v402_v17 = vpack.c.bf16 %v119_v16, %v118_v15  ;;  %v121_v19 = vld [vmem:[%s557_s2 + $0x58] sm:$0xff]  ;;  %v122_v21 = vld [vmem:[%s557_s2 + $0x60] sm:$0xff]  ;;  %v123_v22 = vld [vmem:[%s557_s2 + $0x68] sm:$0xff]  ;;  %v99_v28 = vshrl.u32 %v98_v27, 7 }
   0xb   :  { %393 = vmatpush3.bf16.msra.mxu1 %v390_v8  ;;  %v406_v20 = vpack.c.bf16 %v121_v19, %v120_v18  ;;  %v410_v23 = vpack.c.bf16 %v123_v22, %v122_v21  ;;  %v124_v24 = vld [vmem:[%s557_s2 + $0x70] sm:$0xff]  ;;  %v125_v25 = vld [vmem:[%s557_s2 + $0x78] sm:$0xff]  ;;  %v23_v30 = vld [vmem:[%s559_s4] sm:$0xf] }
   0xc   :  { %395 = vmatprep.subr.bf16.mxu1 %v394_v11  ;;  %v414_v26 = vpack.c.bf16 %v125_v25, %v124_v24  ;;  %v100_v29 = vsub.s32 0, %v99_v28  ;;  %v105_v31 = vsub.s32 1, %v99_v28  ;;  %v206_v40 = vld [vmem:[%s558_s3] sm:$0xff]  ;;  %v292_v48 = vsub.s32 2, %v99_v28  ;;  %s449_s3 = smov [#allocation2]  }
   0xd   :  { %381 = vmatprep.subr.mxu0 %v206_v40  ;;  %v297_v50 = vsub.s32 3, %v99_v28  ;;  %s307_s4 = sshll.u32 %s449_s3, 4  ;;  %s308_s4 = int_to_ptr.vmem [resolvable:$true] %s307_s4 }
   0xe   :  { %v101_v32 = vrot.slane %v23_v30, %v100_v29  ;;  %v106_v33 = vrot.slane %v23_v30, %v105_v31  ;;  %382 = vmatpush3.msra.mxu0 %v206_v40  ;;  %v293_v53 = vrot.slane %v23_v30, %v292_v48  ;;  %s423_s28 = scalar_lea.vmem %s308_s4, 128  ;;  %p428_p1 = scmp.lt.s32.totalorder %s308_s4, %s308_s4 }
   0xf   :  { %397 = vmatpush3.bf16.msra.mxu1 %v394_v11  ;;  %v298_v55 = vrot.slane %v23_v30, %v297_v50  ;;  %p424_p0 = scmp.ne.s32.totalorder %s308_s4, %s423_s28  ;;  %p429_p2 = scmp.lt.s32.totalorder %s423_s28, %s423_s28 }
  0x10   :  { %399 = vmatprep.subr.bf16.mxu1 %v398_v14  ;;  %v102_v34 = vmul.f32 %v101_v32, %v21_v0 }
  0x11   :  { %p430_p3 = por %p429_p2, %p428_p1 }
  0x13   :  { %401 = vmatpush3.bf16.msra.mxu1 %v398_v14  ;;  %p431_p4 = pnand %p430_p3, %p424_p0 }
  0x14   :  { %403 = vmatprep.subr.bf16.mxu1 %v402_v17 }
  0x17   :  { %405 = vmatpush3.bf16.msra.mxu1 %v402_v17 }
  0x18   :  { %407 = vmatprep.subr.bf16.mxu1 %v406_v20 }
  0x1b   :  { %409 = vmatpush3.bf16.msra.mxu1 %v406_v20 }
  0x1c   :  { %411 = vmatprep.subr.bf16.mxu1 %v410_v23 }
  0x1f   :  { %413 = vmatpush3.bf16.msra.mxu1 %v410_v23 }
  0x20   :  { %415 = vmatprep.subr.bf16.mxu1 %v414_v26 }
  0x23   :  { %417 = vmatpush3.bf16.msra.mxu1 %v414_v26 }
  0xd6   :  { %v94_v35 = vpop.f32.mrb[0].mxu0 }
  0xd7   :  { %v107_v36 = vmul.f32 %v106_v33, %v94_v35  ;;  %v345_v37 = vpop.f32.mrb[1].mxu0 }
  0xd9   :  { %v108_v38 = vadd.f32 %v107_v36, %v102_v34 }
  0xdb   :  { %378 = vmatprep.mubr.f32.mxu1 %v108_v38  ;;  %v109_v39 = vmul.f32 %v108_v38, %v108_v38 }
  0xdd   :  { %379 = vmatmul.mubr.f32.vlgmr.msra.gmra.mrb[0].mxu1 %v109_v39 }
 0x1b0   :  { %v380_v41 = vpop.f32.mrb[0].mxu1 }
 0x1b1   :  { %v192_v42 = vpop.f32.mrb[1].mxu1 }
 0x1b2   :  { %v201_v43 = vmul.f32 %v192_v42, %v192_v42  ;;  %383 = vmatprep.mubr.msk.f32.mxu0 %vm24_vm1, %v192_v42 }
 0x1b4   :  { %v202_v44 = vsub.f32 %v380_v41, %v201_v43 }
 0x1b6   :  { %v203_v45 = vmax.f32 %v202_v44, 0.0 }
 0x1b8   :  { %v204_v46 = vadd.f32 1e-12, %v203_v45 }
 0x1ba   :  { %421 = vrsqrt.f32 %v204_v46 }
 0x1c4   :  { %v422_v47 = vpop.eup %421 }
 0x1c5   :  { %384 = vmatmul.mubr.msk.f32.vlgmr.msra.gmra.mrb[2].mxu0 %vm24_vm1, %v422_v47 }
 0x298   :  { %v385_v49 = vpop.f32.mrb[2].mxu0 }
 0x299   :  { %v279_v51 = vpop.f32.mrb[3].mxu0 }
 0x29a   :  { %v288_v52 = vsub.f32 %v108_v38, %v279_v51 }
 0x29c   :  { %v289_v54 = vmul.f32 %v385_v49, %v288_v52 }
 0x29e   :  { %v294_v56 = vmul.f32 %v293_v53, %v289_v54 }
 0x2a0   :  { %v299_v57 = vadd.f32 %v298_v55, %v294_v56 }
 0x2a2   :  { %300 = vst [vmem:[#allocation2] sm:$0xff] %v299_v57 }
 0x2a3   :  { %434 = shalt.err (!%p431_p4)
}
 0x2a4   :  { %s435_s6 = scalar_lea.hbm %s560_s5, 128 }
 0x2a5   :  { %p436_p5 = scmp.ne.s32.totalorder %s560_s5, %s435_s6  ;;  %p439_p6 = scmp.lt.u32.totalorder %s435_s6, %s560_s5 }
 0x2a7   :  { %p441_p7 = pnand %p439_p6, %p436_p5 }
 0x2a9   :  { %444 = shalt.err (!%p441_p7)
}
 0x2aa   :  { %310 = dma.vmem_to_hbm [thread:$0]  %s308_s4, 128, %s560_s5, [#allocation3]  }
 0x2ab   :  { %445 = dma.done.wait [#allocation3], 128  }
 0x2ac   :  { %446 = vsyncadd [#allocation3], 4294967168 }
 0x2ad   :  { %314 = vsyncpa [#allocation3], 1 }

</bundles_post_ra>
